<compile_context>
chip_gen: v5e
topology: v5e:2x2
jax: 0.10.0
libtpu: 0.0.40
codegen_flags: <defaults>
</compile_context>

<pallas_src>
import functools

import jax
import jax.numpy as jnp
from jax.experimental import pallas as pl
from jax.experimental.pallas import tpu as pltpu

SUBLANE = 8
MAX_TILE_B = 2048  # large-batch tile: amortizes per-grid-step overhead


def _round_up(x: int, m: int) -> int:
    return ((x + m - 1) // m) * m


def _pick_tile_b(B: int) -> int:
    """Batch tile size.

    * tiny B: block == full array (block dim equal to array dim is legal).
    * moderate B: split into 2 near-equal sublane-rounded tiles so both of
      v7x's TensorCores get work on the "parallel" batch axis.
    * large B: 2048-row tiles (bigger tiles amortize ~0.35us/step overhead
      and give the MXU a long M dimension).
    """
    if B <= 2 * SUBLANE:
        return B
    if B <= 2 * MAX_TILE_B:
        return _round_up(pl.cdiv(B, 2), SUBLANE)
    return MAX_TILE_B


def _fused_mlp_kernel(*refs, n_layers: int):
    """refs = (x_ref, w0, b0, ..., w_{L-1}, b_{L-1}, o_ref).

    h = x; for each layer: h = h @ W + b (ReLU on all but the last layer).
    Intermediates never leave VMEM/vregs; only the final result is stored.
    """
    x_ref, o_ref = refs[0], refs[-1]
    wb = refs[1:-1]

    h = x_ref[...]
    for i in range(n_layers):
        w = wb[2 * i][...]
        b = wb[2 * i + 1][...]  # (1, D_out) -> broadcast over the batch rows
        y = jnp.dot(h, w, preferred_element_type=jnp.float32) + b.astype(jnp.float32)
        if i < n_layers - 1:
            y = jnp.maximum(y, 0.0)      # ReLU on hidden layers only
            h = y.astype(w.dtype)        # keep MXU inputs in the compute dtype
        else:
            h = y
    o_ref[...] = h.astype(o_ref.dtype)


def fused_mlp(x, params, *, use_bf16: bool = False, tile_b: int | None = None):
    """Fused MLP forward: one pallas_call for all layers.

    x: (B, D_in).  params: list of (W: (D_in_i, D_out_i), b: (D_out_i,)).
    """
    B, D_in = x.shape
    n_layers = len(params)
    dims = [D_in] + [w.shape[1] for (w, _) in params]
    assert params[0][0].shape[0] == D_in

    if tile_b is None:
        tile_b = _pick_tile_b(B)
    num_tiles = pl.cdiv(B, tile_b)

    out_dtype = x.dtype
    compute_dtype = jnp.bfloat16 if use_bf16 else x.dtype

    # Pre-cast ONCE in the wrapper (not per grid step inside the kernel).
    x_in = x.astype(compute_dtype)
    flat_wb = []
    for (w, b) in params:
        flat_wb.append(w.astype(compute_dtype))
        flat_wb.append(b.reshape(1, -1).astype(jnp.float32))  # bias stays f32

    # Unpadded specs: feature dims equal the full array dims (no lane padding),
    # batch tiled over the grid; weights/biases use a constant index_map so
    # they are DMA'd once and stay resident in VMEM across grid steps.
    in_specs = [pl.BlockSpec((tile_b, D_in), lambda i: (i, 0))]
    for li in range(n_layers):
        d_in_l, d_out_l = dims[li], dims[li + 1]
        in_specs.append(pl.BlockSpec((d_in_l, d_out_l), lambda i: (0, 0)))
        in_specs.append(pl.BlockSpec((1, d_out_l), lambda i: (0, 0)))
    out_spec = pl.BlockSpec((tile_b, dims[-1]), lambda i: (i, 0))

    return pl.pallas_call(
        functools.partial(_fused_mlp_kernel, n_layers=n_layers),
        out_shape=jax.ShapeDtypeStruct((B, dims[-1]), out_dtype),
        grid=(num_tiles,),
        in_specs=in_specs,
        out_specs=out_spec,
        compiler_params=pltpu.CompilerParams(
            # Batch tiles are independent -> shard across v7x's 2 TensorCores.
            dimension_semantics=("parallel",),
            # Explicit budget; generous on all generations for this model size.
            vmem_limit_bytes=32 * 1024 * 1024,
        ),
    )(x_in, *flat_wb)


@functools.partial(jax.jit, static_argnames=("use_bf16",))
def mlp_forward(params, x, use_bf16: bool = False):
    """Equivalent of MLPModel.forward (hidden Linear+ReLU layers, final Linear)."""
    return fused_mlp(x, params, use_bf16=use_bf16)


@jax.jit
def mlp_forward_xla(params, x):
    """Plain fused-XLA forward (reference / tiny-batch fallback)."""
    h = x
    for i, (w, b) in enumerate(params):
        h = h @ w + b
        if i < len(params) - 1:
            h = jnp.maximum(h, 0.0)
    return h


def mlp_forward_auto(params, x, *, use_bf16: bool = False, small_batch_threshold: int = 64):
    """At tiny B the call is launch/weight-DMA dominated -> plain XLA wins."""
    if x.shape[0] <= small_batch_threshold:
        return mlp_forward_xla(params, x)
    return mlp_forward(params, x, use_bf16=use_bf16)


def init_mlp_params(key, input_dim, hidden_layers, output_dim, dtype=jnp.float32):
    """Matches nn.Linear default init U(-1/sqrt(fan_in), +1/sqrt(fan_in)).

    Weights stored as (in_dim, out_dim) (transposed from PyTorch's (out, in))
    so the kernel computes y = x @ W + b directly on the MXU.
    """
    dims = [input_dim] + list(hidden_layers) + [output_dim]
    params = []
    for i in range(len(dims) - 1):
        fan_in, fan_out = dims[i], dims[i + 1]
        key, kw, kb = jax.random.split(key, 3)
        bound = 1.0 / (fan_in ** 0.5)
        w = jax.random.uniform(kw, (fan_in, fan_out), dtype, minval=-bound, maxval=bound)
        b = jax.random.uniform(kb, (fan_out,), dtype, minval=-bound, maxval=bound)
        params.append((w, b))
    return params


if __name__ == "__main__":
    # Config implied by predict(): input = 4 (state) + 1 (action) + 12 (srd) = 17,
    # output = 4 (next state) + 12 (next srd) + 1 (reward) = 17.
    # TODO(synk): Adam optimizer, StandardScaler, training/update loops and
    # save/load are not part of the forward pass and are not implemented here.
    config = {
        "input_dim": 17,
        "hidden_layers": [32, 32],
        "output_dim": 17,
        "learning_rate": 1e-3,
    }

    key = jax.random.PRNGKey(0)
    kp, kx1, kx2 = jax.random.split(key, 3)
    params = init_mlp_params(
        kp, config["input_dim"], config["hidden_layers"], config["output_dim"]
    )

    # 1) Tiny batch (the predict() path): single full-array block, one grid step.
    x_small = jax.random.normal(kx1, (2, config["input_dim"]), jnp.float32)
    out_small = jax.block_until_ready(mlp_forward(params, x_small))
    assert out_small.shape == (2, config["output_dim"]), out_small.shape
    ref_small = mlp_forward_xla(params, x_small)
    assert jnp.allclose(out_small, ref_small, atol=2e-5, rtol=2e-5)

    # 2) Batch that does not divide the tile -> exercises partial-last-block
    #    masking (OOB rows are dropped on store; rows are independent).
    x_mid = jax.random.normal(kx2, (100, config["input_dim"]), jnp.float32)
    out_mid = jax.block_until_ready(mlp_forward(params, x_mid))
    assert out_mid.shape == (100, config["output_dim"]), out_mid.shape
    ref_mid = mlp_forward_xla(params, x_mid)
    assert jnp.allclose(out_mid, ref_mid, atol=2e-5, rtol=2e-5)

    # 3) bf16 MXU path (throughput mode on v5e/v6e/v7x); looser tolerance since
    #    MXU inputs are bf16 (accumulation stays f32).
    out_bf16 = jax.block_until_ready(mlp_forward(params, x_mid, use_bf16=True))
    assert jnp.allclose(out_bf16, ref_mid, atol=5e-2, rtol=5e-2)

    print("KERNEL_OK")
</pallas_src>

<mosaic_0001>
module attributes {stable_mosaic.version = 11 : i64} {
  func.func @_fused_mlp_kernel(%arg0: i32, %arg1: memref<2x17xf32, #tpu.memory_space<vmem>>, %arg2: memref<17x32xf32, #tpu.memory_space<vmem>>, %arg3: memref<1x32xf32, #tpu.memory_space<vmem>>, %arg4: memref<32x32xf32, #tpu.memory_space<vmem>>, %arg5: memref<1x32xf32, #tpu.memory_space<vmem>>, %arg6: memref<32x17xf32, #tpu.memory_space<vmem>>, %arg7: memref<1x17xf32, #tpu.memory_space<vmem>>, %arg8: memref<2x17xf32, #tpu.memory_space<vmem>>) attributes {dimension_semantics = [#tpu.dimension_semantics<parallel>], iteration_bounds = array<i64: 1>, scalar_prefetch = 0 : i64, scratch_operands = 0 : i64, tpu.core_type = #tpu.core_type<tc>, window_params = [{transform_indices = @transform_0, window_bounds = array<i64: 2, 17>}, {pipeline_mode = #tpu.pipeline_mode<synchronous>, transform_indices = @transform_1, window_bounds = array<i64: 17, 32>}, {pipeline_mode = #tpu.pipeline_mode<synchronous>, transform_indices = @transform_2, window_bounds = array<i64: 1, 32>}, {pipeline_mode = #tpu.pipeline_mode<synchronous>, transform_indices = @transform_3, window_bounds = array<i64: 32, 32>}, {pipeline_mode = #tpu.pipeline_mode<synchronous>, transform_indices = @transform_4, window_bounds = array<i64: 1, 32>}, {pipeline_mode = #tpu.pipeline_mode<synchronous>, transform_indices = @transform_5, window_bounds = array<i64: 32, 17>}, {pipeline_mode = #tpu.pipeline_mode<synchronous>, transform_indices = @transform_6, window_bounds = array<i64: 1, 17>}, {transform_indices = @transform_7, window_bounds = array<i64: 2, 17>}]} {
    %c0 = arith.constant 0 : index
    %c0_0 = arith.constant 0 : index
    %0 = vector.load %arg1[%c0, %c0_0] : memref<2x17xf32, #tpu.memory_space<vmem>>, vector<2x17xf32>
    %c0_1 = arith.constant 0 : index
    %c0_2 = arith.constant 0 : index
    %1 = vector.load %arg2[%c0_1, %c0_2] : memref<17x32xf32, #tpu.memory_space<vmem>>, vector<17x32xf32>
    %c0_3 = arith.constant 0 : index
    %c0_4 = arith.constant 0 : index
    %2 = vector.load %arg3[%c0_3, %c0_4] : memref<1x32xf32, #tpu.memory_space<vmem>>, vector<1x32xf32>
    %cst = arith.constant dense<0.000000e+00> : vector<2x32xf32>
    %3 = tpu.matmul %0, %1, %cst {dimension_numbers = #tpu.dot_dimension_numbers<[1], [0], [0], [1], [0, 0, 1, 1], [], []>} : vector<2x17xf32>, vector<17x32xf32>, vector<2x32xf32> -> vector<2x32xf32>
    %4 = vector.broadcast %2 : vector<1x32xf32> to vector<2x32xf32>
    %5 = arith.addf %3, %4 : vector<2x32xf32>
    %cst_5 = arith.constant 0.000000e+00 : f32
    %6 = vector.broadcast %cst_5 : f32 to vector<2x32xf32>
    %7 = arith.maximumf %5, %6 : vector<2x32xf32>
    %c0_6 = arith.constant 0 : index
    %c0_7 = arith.constant 0 : index
    %8 = vector.load %arg4[%c0_6, %c0_7] : memref<32x32xf32, #tpu.memory_space<vmem>>, vector<32x32xf32>
    %c0_8 = arith.constant 0 : index
    %c0_9 = arith.constant 0 : index
    %9 = vector.load %arg5[%c0_8, %c0_9] : memref<1x32xf32, #tpu.memory_space<vmem>>, vector<1x32xf32>
    %cst_10 = arith.constant dense<0.000000e+00> : vector<2x32xf32>
    %10 = tpu.matmul %7, %8, %cst_10 {dimension_numbers = #tpu.dot_dimension_numbers<[1], [0], [0], [1], [0, 0, 1, 1], [], []>} : vector<2x32xf32>, vector<32x32xf32>, vector<2x32xf32> -> vector<2x32xf32>
    %11 = vector.broadcast %9 : vector<1x32xf32> to vector<2x32xf32>
    %12 = arith.addf %10, %11 : vector<2x32xf32>
    %cst_11 = arith.constant 0.000000e+00 : f32
    %13 = vector.broadcast %cst_11 : f32 to vector<2x32xf32>
    %14 = arith.maximumf %12, %13 : vector<2x32xf32>
    %c0_12 = arith.constant 0 : index
    %c0_13 = arith.constant 0 : index
    %15 = vector.load %arg6[%c0_12, %c0_13] : memref<32x17xf32, #tpu.memory_space<vmem>>, vector<32x17xf32>
    %c0_14 = arith.constant 0 : index
    %c0_15 = arith.constant 0 : index
    %16 = vector.load %arg7[%c0_14, %c0_15] : memref<1x17xf32, #tpu.memory_space<vmem>>, vector<1x17xf32>
    %cst_16 = arith.constant dense<0.000000e+00> : vector<2x17xf32>
    %17 = tpu.matmul %14, %15, %cst_16 {dimension_numbers = #tpu.dot_dimension_numbers<[1], [0], [0], [1], [0, 0, 1, 1], [], []>} : vector<2x32xf32>, vector<32x17xf32>, vector<2x17xf32> -> vector<2x17xf32>
    %18 = vector.broadcast %16 : vector<1x17xf32> to vector<2x17xf32>
    %19 = arith.addf %17, %18 : vector<2x17xf32>
    %c0_17 = arith.constant 0 : index
    %c0_18 = arith.constant 0 : index
    %20 = vector.load %arg8[%c0_17, %c0_18] : memref<2x17xf32, #tpu.memory_space<vmem>>, vector<2x17xf32>
    tpu.vector_store %arg8[%c0_17, %c0_18], %19 {strides = array<i32>} : memref<2x17xf32, #tpu.memory_space<vmem>>, vector<2x17xf32>,
    return
  }
  func.func @transform_0(%arg0: i32) -> (i32, i32) {
    %c0_i32 = arith.constant 0 : i32
    %c0_i32_0 = arith.constant 0 : i32
    return %arg0, %c0_i32 : i32, i32
  }
  func.func @transform_1(%arg0: i32) -> (i32, i32) {
    %c0_i32 = arith.constant 0 : i32
    %c0_i32_0 = arith.constant 0 : i32
    %c0_i32_1 = arith.constant 0 : i32
    return %c0_i32, %c0_i32_0 : i32, i32
  }
  func.func @transform_2(%arg0: i32) -> (i32, i32) {
    %c0_i32 = arith.constant 0 : i32
    %c0_i32_0 = arith.constant 0 : i32
    %c0_i32_1 = arith.constant 0 : i32
    return %c0_i32, %c0_i32_0 : i32, i32
  }
  func.func @transform_3(%arg0: i32) -> (i32, i32) {
    %c0_i32 = arith.constant 0 : i32
    %c0_i32_0 = arith.constant 0 : i32
    %c0_i32_1 = arith.constant 0 : i32
    return %c0_i32, %c0_i32_0 : i32, i32
  }
  func.func @transform_4(%arg0: i32) -> (i32, i32) {
    %c0_i32 = arith.constant 0 : i32
    %c0_i32_0 = arith.constant 0 : i32
    %c0_i32_1 = arith.constant 0 : i32
    return %c0_i32, %c0_i32_0 : i32, i32
  }
  func.func @transform_5(%arg0: i32) -> (i32, i32) {
    %c0_i32 = arith.constant 0 : i32
    %c0_i32_0 = arith.constant 0 : i32
    %c0_i32_1 = arith.constant 0 : i32
    return %c0_i32, %c0_i32_0 : i32, i32
  }
  func.func @transform_6(%arg0: i32) -> (i32, i32) {
    %c0_i32 = arith.constant 0 : i32
    %c0_i32_0 = arith.constant 0 : i32
    %c0_i32_1 = arith.constant 0 : i32
    return %c0_i32, %c0_i32_0 : i32, i32
  }
  func.func @transform_7(%arg0: i32) -> (i32, i32) {
    %c0_i32 = arith.constant 0 : i32
    %c0_i32_0 = arith.constant 0 : i32
    return %arg0, %c0_i32 : i32, i32
  }
}

</mosaic_0001>

<bundles_post_ra>
// kernel: mlp_forward.1
= control target key start
LH: loop header
LB: loop body
LE: loop exit
PB: predicated region body
PF: predicated region fallthrough
CT: control target
= control target key end

     0   :  { %vm39_vm0 = vcmask 1040384   ;;  %vm35_vm1 = vcmask 138240   ;;  %s269_s0 = inlined_call_operand.vmem [shape: f32[2,17], index: 0, kind: input, shape index: {}]   ;;  %s270_s1 = inlined_call_operand.vmem [shape: f32[17,32], index: 1, kind: input, shape index: {}]   ;;  %s271_s2 = inlined_call_operand.vmem [shape: f32[1,32], index: 2, kind: input, shape index: {}]   ;;  %s272_s3 = inlined_call_operand.vmem [shape: f32[32,32], index: 3, kind: input, shape index: {}]   ;;  %s273_s4 = inlined_call_operand.vmem [shape: f32[1,32], index: 4, kind: input, shape index: {}]   ;;  %s274_s5 = inlined_call_operand.vmem [shape: f32[32,17], index: 5, kind: input, shape index: {}]   ;;  %s275_s6 = inlined_call_operand.vmem [shape: f32[1,17], index: 6, kind: input, shape index: {}]   ;;  %s276_s7 = inlined_call_operand.hbm [shape: f32[2,17], index: 7, kind: output, shape index: {}]  }
   0x1   :  { %v30_v0 = vld [vmem:[%s270_s1 + $0x10] sm:$0x1]  ;;  %v29_v1 = vld [vmem:[%s270_s1 + $0x8] sm:$0xff]  ;;  %v67_v2 = vld [vmem:[%s272_s3 + $0x18] sm:$0xff] }
   0x2   :  { %146 = vmatpush.msk.msra.mxu0 %vm39_vm0, %v30_v0  ;;  %v28_v3 = vld [vmem:[%s270_s1] sm:$0xff]  ;;  %88 = vmatpush.msra.mxu1 %v67_v2 }
   0x3   :  { %v27_v4 = vld [vmem:[%s269_s0] sm:$0x3] }
   0x4   :  { %57 = vmatpush.msra.mxu0 %v29_v1 }
   0x5   :  { %12 = vsyncpa [#allocation3], 0  ;;  %v66_v5 = vld [vmem:[%s272_s3 + $0x10] sm:$0xff]  ;;  %v65_v6 = vld [vmem:[%s272_s3 + $0x8] sm:$0xff]  ;;  %vm72_vm2 = vcmask 261120   ;;  %s180_s27 = smov [#allocation2]  }
   0x6   :  { %58 = vmatpush.msra.mxu0 %v28_v3  ;;  %89 = vmatpush.msra.mxu1 %v66_v5  ;;  %v64_v7 = vld [vmem:[%s272_s3] sm:$0xff]  ;;  %v100_v8 = vld [vmem:[%s274_s5 + $0x18] sm:$0xff]  ;;  %v99_v13 = vld [vmem:[%s274_s5 + $0x10] sm:$0xff]  ;;  %s135_s28 = sshll.u32 %s180_s27, 4  ;;  %s137_s8 = sshll.u32 %s276_s7, 4  ;;  %vm128_vm3 = vcmask 132096   ;;  %s136_s28 = int_to_ptr.vmem [resolvable:$true] %s135_s28  ;;  %s138_s8 = int_to_ptr.hbm [resolvable:$true] %s137_s8 }
   0x7   :  { %147 = vmatmul.msk.f32.vlgmr.msra.gmra.mxu0 %vm35_vm1, %v27_v4  ;;  %120 = vmatpush.msra.mxu2 %v100_v8  ;;  %v151_v9 = vld [vmem:[%s271_s2] ss:$0 sm:$0xff]  ;;  %v98_v14 = vld [vmem:[%s274_s5 + $0x8] sm:$0xff] }
   0x8   :  { %90 = vmatpush.msra.mxu1 %v65_v6  ;;  %v97_v15 = vld [vmem:[%s274_s5] sm:$0xff] }
   0x9   :  { %121 = vmatpush.msra.mxu2 %v99_v13  ;;  %v152_v16 = vld [vmem:[%s273_s4] ss:$0 sm:$0xff] }
   0xa   :  { %91 = vmatpush.msra.mxu1 %v64_v7  ;;  %v153_v20 = vld [vmem:[%s275_s6] ss:$0 sm:$0xff] }
   0xb   :  { %122 = vmatpush.msra.mxu2 %v98_v14 }
   0xd   :  { %123 = vmatpush.msra.mxu2 %v97_v15 }
  0x84   :  { %v60_v10 = vpop.f32.mrf.mxu0 }
  0x85   :  { %v61_v11 = vadd.f32 %v151_v9, %v60_v10 }
  0x87   :  { %v63_v12 = vmax.f32 %v61_v11, 0.0 }
  0x89   :  { %148 = vmatmul.msk.f32.vlgmr.msra.gmra.mxu1 %vm72_vm2, %v63_v12 }
 0x106   :  { %v93_v17 = vpop.f32.mrf.mxu1 }
 0x107   :  { %v94_v18 = vadd.f32 %v152_v16, %v93_v17 }
 0x109   :  { %v96_v19 = vmax.f32 %v94_v18, 0.0 }
 0x10b   :  { %149 = vmatmul.msk.f32.vlgmr.msra.gmra.mxu2 %vm72_vm2, %v96_v19 }
 0x18e   :  { %v125_v21 = vpop.f32.mrf.mxu2 }
 0x18f   :  { %v126_v22 = vadd.f32 %v153_v20, %v125_v21 }
 0x191   :  { %129 = vst.msk [vmem:[#allocation2] sm:$0x3] %vm128_vm3, %v126_v22 }
 0x192   :  { %140 = dma.vmem_to_hbm [thread:$0]  %s136_s28, 32, %s138_s8, [#allocation3]  }
 0x193   :  { %178 = dma.done.wait [#allocation3], 32  }
 0x194   :  { %179 = vsyncadd [#allocation3], 4294967264 }
 0x195   :  { %145 = vsyncpa [#allocation3], 1 }

</bundles_post_ra>
